<compile_context>
chip_gen: v6e
topology: v6e:2x2x1
jax: 0.10.0
libtpu: 0.0.40
codegen_flags: <defaults>
</compile_context>

<pallas_src>
import math
import random
import functools

import numpy as np
import jax
import jax.numpy as jnp
from jax.experimental import pallas as pl
from jax.experimental.pallas import tpu as pltpu


# ---------------------------------------------------------------------------
# LPN geometry helpers (host-side, trace-time constants)
# ---------------------------------------------------------------------------
def _part_masks(H, W, num_parts):
    """Per-part 0/1 masks over the H*W positions.

    Row 0 selects the full map; rows 1..num_parts-1 select the nested centered blocks.
    Returns (masks [num_parts, H*W] f32, areas tuple of length num_parts).
    """
    c_h, c_w = H // 2, W // 2
    # TODO(synk): the per_h<1 bilinear-upsample fallback of the PyTorch reference is not
    # implemented; per_h/per_w are clamped to >=1 instead (never triggered here).
    per_h = max(1, H // (2 * num_parts))
    per_w = max(1, W // (2 * num_parts))
    hh = np.arange(H * W) // W
    ww = np.arange(H * W) % W
    masks = [np.ones(H * W, np.float32)]
    areas = []
    for i in range(1, num_parts):
        m = ((hh >= c_h - i * per_h) & (hh < c_h + i * per_h)
             & (ww >= c_w - i * per_w) & (ww < c_w + i * per_w)).astype(np.float32)
        masks.append(m)
        areas.append(max(int(m.sum()), 1))
    areas.append(H * W)   # outer ring pooled over the whole map in the reference
    return np.stack(masks, 0), tuple(areas)


# ---------------------------------------------------------------------------
# Fused kernel: stem patch-embed + GAP + LPN + reducer (pool-before-project)
# ---------------------------------------------------------------------------
def _fused_stem_pool_kernel(x_ref, selT_ref, stem_w_ref, pbias_ref, rw_ref, rb_ref,
                            gap_ref, lpn_ref, red_ref, acc_ref,
                            *, G, num_parts, hw, areas, C, rd):
    # x_ref    : (1, tm, K)        bf16 patchified pixels, G images flattened along tm
    # selT_ref : (S_total, tm)     bf16 block-diagonal selector (part-major over images)
    # stem_w   : (K, C)            f32 stem weights
    # pbias    : (S_total, C)      f32 counts[row] * stem_bias
    # rw / rb  : (P*C, rd)/(1, rd) f32 reducer weights / bias
    # gap/lpn/red : (1, G, C) / (1, G, P*C) / (1, G, rd) outputs for this image group
    # acc_ref  : (S_total, K) f32  selector-weighted pixel sums (spatial reduction)
    m = pl.program_id(1)

    @pl.when(m == 0)
    def _init():
        acc_ref[...] = jnp.zeros_like(acc_ref)

    # pool-before-project: selector-weighted pixel sums for this spatial tile (MXU).
    acc_ref[...] += jnp.dot(selT_ref[...], x_ref[0],
                            preferred_element_type=jnp.float32)

    @pl.when(m == pl.num_programs(1) - 1)
    def _finalize():
        pooled = acc_ref[...]                                      # [S_total, K] f32
        # exact: sum(x@W + b) over a block == (sum x)@W + count*b
        feat = jnp.dot(pooled, stem_w_ref[...],
                       preferred_element_type=jnp.float32) + pbias_ref[...]
        # row layout: part j of local image g sits at row j*G + g
        full = feat[0:G, :]                                        # [G, C] full-map sums
        gap_ref[0, :, :] = (full * (1.0 / hw)).astype(gap_ref.dtype)

        red = jnp.zeros((G, rd), jnp.float32)
        for i in range(1, num_parts + 1):
            if i == 1:
                ring = feat[G:2 * G, :]
            elif i < num_parts:
                ring = feat[i * G:(i + 1) * G, :] - feat[(i - 1) * G:i * G, :]
            else:
                ring = full - feat[(num_parts - 1) * G:num_parts * G, :]
            ring = ring * (1.0 / areas[i - 1])                     # [G, C]
            # lane-dense direct write of this ring; no lane concat
            lpn_ref[0, :, (i - 1) * C:i * C] = ring.astype(lpn_ref.dtype)
            # reducer fused: red += ring @ W_r[(i-1)*C:i*C]  (== lpn @ W_r)
            red = red + jnp.dot(ring, rw_ref[(i - 1) * C:i * C, :],
                                preferred_element_type=jnp.float32)
        red_ref[0, :, :] = (red + rb_ref[...]).astype(red_ref.dtype)


# ---------------------------------------------------------------------------
# Model
# ---------------------------------------------------------------------------
class TimmModelGeomatchPallas:
    """Pallas re-implementation of TimmModel_Geomatch.forward (scaled-down shapes).

    Real module: ConvNeXt-large backbone (C=1024 -> LPN 4096 -> reducer 1024).
    Here: C=embed_dim=128 -> LPN 4*128=512 -> reducer 128 (same structure, small shapes).
    """

    def __init__(self, key, in_chans=3, embed_dim=128, reduce_dim=128,
                 img_size=32, random_fov=False, patch=4, num_parts=4):
        self.img_size = img_size
        self.random_fov = random_fov
        self.patch = patch
        self.embed_dim = embed_dim
        self.reduce_dim = reduce_dim
        self.num_parts = num_parts
        self.k_raw = patch * patch * in_chans          # stem contraction dim (no pad)

        k1, k2, k3, k4 = jax.random.split(key, 4)
        # deterministic synthetic weights (no checkpoint loading); weights kept f32
        self.stem_w = 0.02 * jax.random.normal(k1, (self.k_raw, embed_dim), jnp.float32)
        self.stem_b = (0.02 * jax.random.normal(k2, (embed_dim,), jnp.float32)
                       ).reshape(1, embed_dim)
        self.reducer_w = 0.02 * jax.random.normal(
            k3, (num_parts * embed_dim, reduce_dim), jnp.float32)
        self.reducer_b = (0.02 * jax.random.normal(k4, (reduce_dim,), jnp.float32)
                          ).reshape(1, reduce_dim)
        # defined but unused in forward, exactly like the reference
        self.logit_scale = jnp.array(math.log(1.0 / 0.07), jnp.float32)

        self._call_cache = {}

    # ---- plain-JAX glue: NCHW -> patchified [B, Hf*Wf, K] (bf16, no K pad)
    # TODO(synk): a BlockSpec index_map gather straight off the NHWC image would avoid
    # materializing the patchified copy in HBM; kept as JAX glue here.
    def _patchify(self, img_nchw):
        B, Cin, H, W = img_nchw.shape
        P = self.patch
        Hf, Wf = H // P, W // P
        x = img_nchw.astype(jnp.bfloat16)                       # cast before the glue
        x = jnp.transpose(x, (0, 2, 3, 1))[:, :Hf * P, :Wf * P, :]
        x = x.reshape(B, Hf, P, Wf, P, Cin)
        x = jnp.transpose(x, (0, 1, 3, 2, 4, 5)).reshape(B, Hf * Wf, P * P * Cin)
        return x, Hf, Wf

    @staticmethod
    def _pick_group(B):
        # fold G images per grid step, keeping >=2 parallel steps for megacore/v7x
        for G in (4, 2):
            if B % G == 0 and B // G >= 2:
                return G
        return 1

    # ---- build (and cache) the fused pallas_call + selector constants per shape config
    def _get_call(self, B, Hf, Wf):
        key = (B, Hf, Wf)
        if key in self._call_cache:
            return self._call_cache[key]

        hw = Hf * Wf
        G = self._pick_group(B)
        ngroups = B // G
        P, C, rd, K = self.num_parts, self.embed_dim, self.reduce_dim, self.k_raw

        masks, areas = _part_masks(Hf, Wf, P)

        # spatial tiling of the flattened (G images) axis; pad to lane-dense tiles when
        # the map is large enough to need tiling (keeps v7x VMEM bounded).
        if G * hw <= 512:
            hwp, tm, num_m = hw, G * hw, 1
        else:
            hwp = ((hw + 127) // 128) * 128
            total = G * hwp
            tm = next(t for t in (512, 256, 128) if total % t == 0)
            num_m = total // tm

        S_total = ((P * G + 7) // 8) * 8               # 8-aligned selector rows
        sel = np.zeros((S_total, G * hwp), np.float32)
        counts = np.zeros((S_total, 1), np.float32)
        for j in range(P):
            for g in range(G):
                r = j * G + g                          # part-major row ordering
                sel[r, g * hwp: g * hwp + hw] = masks[j]
                counts[r, 0] = float(masks[j].sum())
        selT = jnp.asarray(sel, jnp.bfloat16)
        pooled_bias = jnp.asarray(counts) * self.stem_b          # [S_total, C] f32

        kern = functools.partial(_fused_stem_pool_kernel, G=G, num_parts=P, hw=hw,
                                 areas=tuple(areas), C=C, rd=rd)

        call = pl.pallas_call(
            kern,
            out_shape=(jax.ShapeDtypeStruct((ngroups, G, C), jnp.float32),
                       jax.ShapeDtypeStruct((ngroups, G, P * C), jnp.float32),
                       jax.ShapeDtypeStruct((ngroups, G, rd), jnp.float32)),
            grid=(ngroups, num_m),
            in_specs=[
                pl.BlockSpec((1, tm, K), lambda g, m: (g, m, 0)),
                pl.BlockSpec((S_total, tm), lambda g, m: (0, m)),
                pl.BlockSpec((K, C), lambda g, m: (0, 0)),
                pl.BlockSpec((S_total, C), lambda g, m: (0, 0)),
                pl.BlockSpec((P * C, rd), lambda g, m: (0, 0)),
                pl.BlockSpec((1, rd), lambda g, m: (0, 0)),
            ],
            out_specs=(
                pl.BlockSpec((1, G, C), lambda g, m: (g, 0, 0)),
                pl.BlockSpec((1, G, P * C), lambda g, m: (g, 0, 0)),
                pl.BlockSpec((1, G, rd), lambda g, m: (g, 0, 0)),
            ),
            scratch_shapes=[pltpu.VMEM((S_total, K), jnp.float32)],
            compiler_params=pltpu.CompilerParams(
                dimension_semantics=("parallel", "arbitrary"),
                vmem_limit_bytes=32 * 1024 * 1024),
        )

        entry = (call, selT, pooled_bias, G, ngroups, hwp, hw)
        self._call_cache[key] = entry
        return entry

    # ---- one fused kernel: (GAP [B,C], LPN [B,P*C], reduced [B,rd])
    def _stem_pool(self, imgs_nchw):
        x, Hf, Wf = self._patchify(imgs_nchw)                    # [B, hw, K] bf16
        B = x.shape[0]
        call, selT, pooled_bias, G, ngroups, hwp, hw = self._get_call(B, Hf, Wf)
        if hwp != hw:
            x = jnp.pad(x, ((0, 0), (0, hwp - hw), (0, 0)))
        x = x.reshape(ngroups, G * hwp, self.k_raw)              # fold images into M
        gap, lpn, red = call(x, selT, self.stem_w, pooled_bias,
                             self.reducer_w, self.reducer_b)
        C = self.embed_dim
        return (gap.reshape(B, C),
                lpn.reshape(B, self.num_parts * C),
                red.reshape(B, self.reduce_dim))

    # ---- `self.model(img)` path (timm backbone with num_classes=0 -> pooled features)
    def backbone(self, img_nchw):
        gap, _, _ = self._stem_pool(img_nchw)
        return gap

    def forward(self, imgq1, imgq2=None, imgr1=None, imgr2=None, return_feature_map=False):
        if imgq2 is not None:
            if not self.random_fov:
                # all four images batched into ONE fused kernel pass (bf16 before concat)
                imgs = jnp.concatenate(
                    [x.astype(jnp.bfloat16) for x in (imgq1, imgq2, imgr1, imgr2)], axis=0)
                gap, _, red = self._stem_pool(imgs)
                if return_feature_map:
                    return tuple(jnp.split(red, 4, axis=0))
                return tuple(jnp.split(gap, 4, axis=0))
            else:
                # host-side random crop of the query-2 field of view, like the reference;
                # quantized to patch*4 buckets so recompiles stay bounded.
                w = imgq2.shape[-1]
                fov = random.randint(int(w * 7 / 36), w)
                bucket = self.patch * 4
                fov = max(bucket, (fov // bucket) * bucket)
                imgq2 = imgq2[..., :fov]
                imgs = jnp.concatenate(
                    [x.astype(jnp.bfloat16) for x in (imgq1, imgr1, imgr2)], axis=0)
                gap, _, _ = self._stem_pool(imgs)
                g1, gr1, gr2 = jnp.split(gap, 3, axis=0)
                g2 = self.backbone(imgq2)
                return (g1, g2, gr1, gr2)
        else:
            return self.backbone(imgq1)


if __name__ == "__main__":
    key = jax.random.PRNGKey(0)
    kparams, kdata = jax.random.split(key)
    model = TimmModelGeomatchPallas(kparams, in_chans=3, embed_dim=128, reduce_dim=128,
                                    img_size=32, random_fov=False)

    k1, k2, k3, k4 = jax.random.split(kdata, 4)
    shape = (2, 3, 32, 32)  # NCHW, like the PyTorch module
    imgq1 = jax.random.normal(k1, shape, jnp.float32)
    imgq2 = jax.random.normal(k2, shape, jnp.float32)
    imgr1 = jax.random.normal(k3, shape, jnp.float32)
    imgr2 = jax.random.normal(k4, shape, jnp.float32)

    # default forward (return_feature_map hard-coded False in the reference)
    outs = model.forward(imgq1, imgq2, imgr1, imgr2)
    # LPN + reducer path (exercises the fused ring features and the fused reducer)
    outs_fm = model.forward(imgq1, imgq2, imgr1, imgr2, return_feature_map=True)
    # single-image path
    single = model.forward(imgq1)

    jax.block_until_ready((outs, outs_fm, single))

    assert len(outs) == 4 and all(o.shape == (2, 128) for o in outs)
    assert len(outs_fm) == 4 and all(o.shape == (2, 128) for o in outs_fm)
    assert single.shape == (2, 128)
    assert all(bool(jnp.all(jnp.isfinite(o))) for o in list(outs) + list(outs_fm) + [single])

    print("KERNEL_OK")
</pallas_src>

<mosaic_0001>
module attributes {stable_mosaic.version = 11 : i64} {
  func.func @_fused_stem_pool_kernel(%arg0: i32, %arg1: i32, %arg2: memref<1x256x48xbf16, #tpu.memory_space<vmem>>, %arg3: memref<16x256xbf16, #tpu.memory_space<vmem>>, %arg4: memref<48x128xf32, #tpu.memory_space<vmem>>, %arg5: memref<16x128xf32, #tpu.memory_space<vmem>>, %arg6: memref<512x128xf32, #tpu.memory_space<vmem>>, %arg7: memref<1x128xf32, #tpu.memory_space<vmem>>, %arg8: memref<1x4x128xf32, #tpu.memory_space<vmem>>, %arg9: memref<1x4x512xf32, #tpu.memory_space<vmem>>, %arg10: memref<1x4x128xf32, #tpu.memory_space<vmem>>, %arg11: memref<16x48xf32, #tpu.memory_space<vmem>>) attributes {dimension_semantics = [#tpu.dimension_semantics<parallel>, #tpu.dimension_semantics<arbitrary>], iteration_bounds = array<i64: 2, 1>, scalar_prefetch = 0 : i64, scratch_operands = 1 : i64, tpu.core_type = #tpu.core_type<tc>, window_params = [{transform_indices = @transform_0, window_bounds = array<i64: 1, 256, 48>}, {transform_indices = @transform_1, window_bounds = array<i64: 16, 256>}, {pipeline_mode = #tpu.pipeline_mode<synchronous>, transform_indices = @transform_2, window_bounds = array<i64: 48, 128>}, {pipeline_mode = #tpu.pipeline_mode<synchronous>, transform_indices = @transform_3, window_bounds = array<i64: 16, 128>}, {pipeline_mode = #tpu.pipeline_mode<synchronous>, transform_indices = @transform_4, window_bounds = array<i64: 512, 128>}, {pipeline_mode = #tpu.pipeline_mode<synchronous>, transform_indices = @transform_5, window_bounds = array<i64: 1, 128>}, {transform_indices = @transform_6, window_bounds = array<i64: 1, 4, 128>}, {transform_indices = @transform_7, window_bounds = array<i64: 1, 4, 512>}, {transform_indices = @transform_8, window_bounds = array<i64: 1, 4, 128>}]} {
    %c0_i32 = arith.constant 0 : i32
    %0 = arith.cmpi eq, %arg1, %c0_i32 : i32
    %1 = arith.extui %0 : i1 to i32
    %c0_i32_0 = arith.constant 0 : i32
    %2 = arith.cmpi ne, %1, %c0_i32_0 : i32
    scf.if %2 {
      %cst_11 = arith.constant 0.000000e+00 : f32
      %13 = vector.broadcast %cst_11 : f32 to vector<16x48xf32>
      %c0_12 = arith.constant 0 : index
      %c0_13 = arith.constant 0 : index
      %14 = vector.load %arg11[%c0_12, %c0_13] : memref<16x48xf32, #tpu.memory_space<vmem>>, vector<16x48xf32>
      tpu.vector_store %arg11[%c0_12, %c0_13], %13 {strides = array<i32>} : memref<16x48xf32, #tpu.memory_space<vmem>>, vector<16x48xf32>,
    } else {
    }
    %c0 = arith.constant 0 : index
    %c0_1 = arith.constant 0 : index
    %3 = vector.load %arg11[%c0, %c0_1] : memref<16x48xf32, #tpu.memory_space<vmem>>, vector<16x48xf32>
    %c0_2 = arith.constant 0 : index
    %c0_3 = arith.constant 0 : index
    %4 = vector.load %arg3[%c0_2, %c0_3] : memref<16x256xbf16, #tpu.memory_space<vmem>>, vector<16x256xbf16>
    %c0_4 = arith.constant 0 : index
    %c0_5 = arith.constant 0 : index
    %c0_6 = arith.constant 0 : index
    %5 = vector.load %arg2[%c0_4, %c0_5, %c0_6] : memref<1x256x48xbf16, #tpu.memory_space<vmem>>, vector<1x256x48xbf16>
    %6 = vector.shape_cast %5 : vector<1x256x48xbf16> to vector<256x48xbf16>
    %cst = arith.constant dense<0.000000e+00> : vector<16x48xf32>
    %7 = tpu.matmul %4, %6, %cst {dimension_numbers = #tpu.dot_dimension_numbers<[1], [0], [0], [1], [0, 0, 1, 1], [], []>} : vector<16x256xbf16>, vector<256x48xbf16>, vector<16x48xf32> -> vector<16x48xf32>
    %8 = arith.addf %3, %7 : vector<16x48xf32>
    %c0_7 = arith.constant 0 : index
    %c0_8 = arith.constant 0 : index
    %9 = vector.load %arg11[%c0_7, %c0_8] : memref<16x48xf32, #tpu.memory_space<vmem>>, vector<16x48xf32>
    tpu.vector_store %arg11[%c0_7, %c0_8], %8 {strides = array<i32>} : memref<16x48xf32, #tpu.memory_space<vmem>>, vector<16x48xf32>,
    %c0_i32_9 = arith.constant 0 : i32
    %10 = arith.cmpi eq, %arg1, %c0_i32_9 : i32
    %11 = arith.extui %10 : i1 to i32
    %c0_i32_10 = arith.constant 0 : i32
    %12 = arith.cmpi ne, %11, %c0_i32_10 : i32
    scf.if %12 {
      %c0_11 = arith.constant 0 : index
      %c0_12 = arith.constant 0 : index
      %13 = vector.load %arg11[%c0_11, %c0_12] : memref<16x48xf32, #tpu.memory_space<vmem>>, vector<16x48xf32>
      %c0_13 = arith.constant 0 : index
      %c0_14 = arith.constant 0 : index
      %14 = vector.load %arg4[%c0_13, %c0_14] : memref<48x128xf32, #tpu.memory_space<vmem>>, vector<48x128xf32>
      %cst_15 = arith.constant dense<0.000000e+00> : vector<16x128xf32>
      %15 = tpu.matmul %13, %14, %cst_15 {dimension_numbers = #tpu.dot_dimension_numbers<[1], [0], [0], [1], [0, 0, 1, 1], [], []>} : vector<16x48xf32>, vector<48x128xf32>, vector<16x128xf32> -> vector<16x128xf32>
      %c0_16 = arith.constant 0 : index
      %c0_17 = arith.constant 0 : index
      %16 = vector.load %arg5[%c0_16, %c0_17] : memref<16x128xf32, #tpu.memory_space<vmem>>, vector<16x128xf32>
      %17 = arith.addf %15, %16 : vector<16x128xf32>
      %18 = vector.extract_strided_slice %17 {offsets = [0, 0], sizes = [4, 128], strides = [1, 1]} : vector<16x128xf32> to vector<4x128xf32>
      %cst_18 = arith.constant 1.562500e-02 : f32
      %19 = vector.broadcast %cst_18 : f32 to vector<4x128xf32>
      %20 = arith.mulf %18, %19 : vector<4x128xf32>
      %c0_19 = arith.constant 0 : index
      %c0_20 = arith.constant 0 : index
      %c0_21 = arith.constant 0 : index
      %21 = vector.load %arg8[%c0_19, %c0_20, %c0_21] : memref<1x4x128xf32, #tpu.memory_space<vmem>>, vector<1x4x128xf32>
      %22 = vector.shape_cast %21 : vector<1x4x128xf32> to vector<4x128xf32>
      %23 = vector.shape_cast %20 : vector<4x128xf32> to vector<1x4x128xf32>
      tpu.vector_store %arg8[%c0_19, %c0_20, %c0_21], %23 {strides = array<i32>} : memref<1x4x128xf32, #tpu.memory_space<vmem>>, vector<1x4x128xf32>,
      %cst_22 = arith.constant 0.000000e+00 : f32
      %24 = vector.broadcast %cst_22 : f32 to vector<4x128xf32>
      %25 = vector.extract_strided_slice %17 {offsets = [4, 0], sizes = [4, 128], strides = [1, 1]} : vector<16x128xf32> to vector<4x128xf32>
      %cst_23 = arith.constant 2.500000e-01 : f32
      %26 = vector.broadcast %cst_23 : f32 to vector<4x128xf32>
      %27 = arith.mulf %25, %26 : vector<4x128xf32>
      %c0_24 = arith.constant 0 : index
      %c0_25 = arith.constant 0 : index
      %c0_26 = arith.constant 0 : index
      %28 = vector.load %arg9[%c0_24, %c0_25, %c0_26] : memref<1x4x512xf32, #tpu.memory_space<vmem>>, vector<1x4x128xf32>
      %29 = vector.shape_cast %28 : vector<1x4x128xf32> to vector<4x128xf32>
      %30 = vector.shape_cast %27 : vector<4x128xf32> to vector<1x4x128xf32>
      tpu.vector_store %arg9[%c0_24, %c0_25, %c0_26], %30 {strides = array<i32>} : memref<1x4x512xf32, #tpu.memory_space<vmem>>, vector<1x4x128xf32>,
      %c0_27 = arith.constant 0 : index
      %c0_28 = arith.constant 0 : index
      %31 = vector.load %arg6[%c0_27, %c0_28] : memref<512x128xf32, #tpu.memory_space<vmem>>, vector<128x128xf32>
      %cst_29 = arith.constant dense<0.000000e+00> : vector<4x128xf32>
      %32 = tpu.matmul %27, %31, %cst_29 {dimension_numbers = #tpu.dot_dimension_numbers<[1], [0], [0], [1], [0, 0, 1, 1], [], []>} : vector<4x128xf32>, vector<128x128xf32>, vector<4x128xf32> -> vector<4x128xf32>
      %33 = arith.addf %24, %32 : vector<4x128xf32>
      %34 = vector.extract_strided_slice %17 {offsets = [8, 0], sizes = [4, 128], strides = [1, 1]} : vector<16x128xf32> to vector<4x128xf32>
      %35 = vector.extract_strided_slice %17 {offsets = [4, 0], sizes = [4, 128], strides = [1, 1]} : vector<16x128xf32> to vector<4x128xf32>
      %36 = arith.subf %34, %35 : vector<4x128xf32>
      %cst_30 = arith.constant 6.250000e-02 : f32
      %37 = vector.broadcast %cst_30 : f32 to vector<4x128xf32>
      %38 = arith.mulf %36, %37 : vector<4x128xf32>
      %c0_31 = arith.constant 0 : index
      %c0_32 = arith.constant 0 : index
      %c128 = arith.constant 128 : index
      %39 = vector.load %arg9[%c0_31, %c0_32, %c128] : memref<1x4x512xf32, #tpu.memory_space<vmem>>, vector<1x4x128xf32>
      %40 = vector.shape_cast %39 : vector<1x4x128xf32> to vector<4x128xf32>
      %41 = vector.shape_cast %38 : vector<4x128xf32> to vector<1x4x128xf32>
      tpu.vector_store %arg9[%c0_31, %c0_32, %c128], %41 {strides = array<i32>} : memref<1x4x512xf32, #tpu.memory_space<vmem>>, vector<1x4x128xf32>,
      %c128_33 = arith.constant 128 : index
      %c0_34 = arith.constant 0 : index
      %42 = vector.load %arg6[%c128_33, %c0_34] : memref<512x128xf32, #tpu.memory_space<vmem>>, vector<128x128xf32>
      %cst_35 = arith.constant dense<0.000000e+00> : vector<4x128xf32>
      %43 = tpu.matmul %38, %42, %cst_35 {dimension_numbers = #tpu.dot_dimension_numbers<[1], [0], [0], [1], [0, 0, 1, 1], [], []>} : vector<4x128xf32>, vector<128x128xf32>, vector<4x128xf32> -> vector<4x128xf32>
      %44 = arith.addf %33, %43 : vector<4x128xf32>
      %45 = vector.extract_strided_slice %17 {offsets = [12, 0], sizes = [4, 128], strides = [1, 1]} : vector<16x128xf32> to vector<4x128xf32>
      %46 = vector.extract_strided_slice %17 {offsets = [8, 0], sizes = [4, 128], strides = [1, 1]} : vector<16x128xf32> to vector<4x128xf32>
      %47 = arith.subf %45, %46 : vector<4x128xf32>
      %cst_36 = arith.constant 0.027777778 : f32
      %48 = vector.broadcast %cst_36 : f32 to vector<4x128xf32>
      %49 = arith.mulf %47, %48 : vector<4x128xf32>
      %c0_37 = arith.constant 0 : index
      %c0_38 = arith.constant 0 : index
      %c256 = arith.constant 256 : index
      %50 = vector.load %arg9[%c0_37, %c0_38, %c256] : memref<1x4x512xf32, #tpu.memory_space<vmem>>, vector<1x4x128xf32>
      %51 = vector.shape_cast %50 : vector<1x4x128xf32> to vector<4x128xf32>
      %52 = vector.shape_cast %49 : vector<4x128xf32> to vector<1x4x128xf32>
      tpu.vector_store %arg9[%c0_37, %c0_38, %c256], %52 {strides = array<i32>} : memref<1x4x512xf32, #tpu.memory_space<vmem>>, vector<1x4x128xf32>,
      %c256_39 = arith.constant 256 : index
      %c0_40 = arith.constant 0 : index
      %53 = vector.load %arg6[%c256_39, %c0_40] : memref<512x128xf32, #tpu.memory_space<vmem>>, vector<128x128xf32>
      %cst_41 = arith.constant dense<0.000000e+00> : vector<4x128xf32>
      %54 = tpu.matmul %49, %53, %cst_41 {dimension_numbers = #tpu.dot_dimension_numbers<[1], [0], [0], [1], [0, 0, 1, 1], [], []>} : vector<4x128xf32>, vector<128x128xf32>, vector<4x128xf32> -> vector<4x128xf32>
      %55 = arith.addf %44, %54 : vector<4x128xf32>
      %56 = vector.extract_strided_slice %17 {offsets = [12, 0], sizes = [4, 128], strides = [1, 1]} : vector<16x128xf32> to vector<4x128xf32>
      %57 = arith.subf %18, %56 : vector<4x128xf32>
      %cst_42 = arith.constant 1.562500e-02 : f32
      %58 = vector.broadcast %cst_42 : f32 to vector<4x128xf32>
      %59 = arith.mulf %57, %58 : vector<4x128xf32>
      %c0_43 = arith.constant 0 : index
      %c0_44 = arith.constant 0 : index
      %c384 = arith.constant 384 : index
      %60 = vector.load %arg9[%c0_43, %c0_44, %c384] : memref<1x4x512xf32, #tpu.memory_space<vmem>>, vector<1x4x128xf32>
      %61 = vector.shape_cast %60 : vector<1x4x128xf32> to vector<4x128xf32>
      %62 = vector.shape_cast %59 : vector<4x128xf32> to vector<1x4x128xf32>
      tpu.vector_store %arg9[%c0_43, %c0_44, %c384], %62 {strides = array<i32>} : memref<1x4x512xf32, #tpu.memory_space<vmem>>, vector<1x4x128xf32>,
      %c384_45 = arith.constant 384 : index
      %c0_46 = arith.constant 0 : index
      %63 = vector.load %arg6[%c384_45, %c0_46] : memref<512x128xf32, #tpu.memory_space<vmem>>, vector<128x128xf32>
      %cst_47 = arith.constant dense<0.000000e+00> : vector<4x128xf32>
      %64 = tpu.matmul %59, %63, %cst_47 {dimension_numbers = #tpu.dot_dimension_numbers<[1], [0], [0], [1], [0, 0, 1, 1], [], []>} : vector<4x128xf32>, vector<128x128xf32>, vector<4x128xf32> -> vector<4x128xf32>
      %65 = arith.addf %55, %64 : vector<4x128xf32>
      %c0_48 = arith.constant 0 : index
      %c0_49 = arith.constant 0 : index
      %66 = vector.load %arg7[%c0_48, %c0_49] : memref<1x128xf32, #tpu.memory_space<vmem>>, vector<1x128xf32>
      %67 = vector.broadcast %66 : vector<1x128xf32> to vector<4x128xf32>
      %68 = arith.addf %65, %67 : vector<4x128xf32>
      %c0_50 = arith.constant 0 : index
      %c0_51 = arith.constant 0 : index
      %c0_52 = arith.constant 0 : index
      %69 = vector.load %arg10[%c0_50, %c0_51, %c0_52] : memref<1x4x128xf32, #tpu.memory_space<vmem>>, vector<1x4x128xf32>
      %70 = vector.shape_cast %69 : vector<1x4x128xf32> to vector<4x128xf32>
      %71 = vector.shape_cast %68 : vector<4x128xf32> to vector<1x4x128xf32>
      tpu.vector_store %arg10[%c0_50, %c0_51, %c0_52], %71 {strides = array<i32>} : memref<1x4x128xf32, #tpu.memory_space<vmem>>, vector<1x4x128xf32>,
    } else {
    }
    return
  }
  func.func @transform_0(%arg0: i32, %arg1: i32) -> (i32, i32, i32) {
    %c0_i32 = arith.constant 0 : i32
    %c0_i32_0 = arith.constant 0 : i32
    return %arg0, %arg1, %c0_i32 : i32, i32, i32
  }
  func.func @transform_1(%arg0: i32, %arg1: i32) -> (i32, i32) {
    %c0_i32 = arith.constant 0 : i32
    %c0_i32_0 = arith.constant 0 : i32
    return %c0_i32, %arg1 : i32, i32
  }
  func.func @transform_2(%arg0: i32, %arg1: i32) -> (i32, i32) {
    %c0_i32 = arith.constant 0 : i32
    %c0_i32_0 = arith.constant 0 : i32
    %c0_i32_1 = arith.constant 0 : i32
    return %c0_i32, %c0_i32_0 : i32, i32
  }
  func.func @transform_3(%arg0: i32, %arg1: i32) -> (i32, i32) {
    %c0_i32 = arith.constant 0 : i32
    %c0_i32_0 = arith.constant 0 : i32
    %c0_i32_1 = arith.constant 0 : i32
    return %c0_i32, %c0_i32_0 : i32, i32
  }
  func.func @transform_4(%arg0: i32, %arg1: i32) -> (i32, i32) {
    %c0_i32 = arith.constant 0 : i32
    %c0_i32_0 = arith.constant 0 : i32
    %c0_i32_1 = arith.constant 0 : i32
    return %c0_i32, %c0_i32_0 : i32, i32
  }
  func.func @transform_5(%arg0: i32, %arg1: i32) -> (i32, i32) {
    %c0_i32 = arith.constant 0 : i32
    %c0_i32_0 = arith.constant 0 : i32
    %c0_i32_1 = arith.constant 0 : i32
    return %c0_i32, %c0_i32_0 : i32, i32
  }
  func.func @transform_6(%arg0: i32, %arg1: i32) -> (i32, i32, i32) {
    %c0_i32 = arith.constant 0 : i32
    %c0_i32_0 = arith.constant 0 : i32
    %c0_i32_1 = arith.constant 0 : i32
    return %arg0, %c0_i32, %c0_i32_0 : i32, i32, i32
  }
  func.func @transform_7(%arg0: i32, %arg1: i32) -> (i32, i32, i32) {
    %c0_i32 = arith.constant 0 : i32
    %c0_i32_0 = arith.constant 0 : i32
    %c0_i32_1 = arith.constant 0 : i32
    return %arg0, %c0_i32, %c0_i32_0 : i32, i32, i32
  }
  func.func @transform_8(%arg0: i32, %arg1: i32) -> (i32, i32, i32) {
    %c0_i32 = arith.constant 0 : i32
    %c0_i32_0 = arith.constant 0 : i32
    %c0_i32_1 = arith.constant 0 : i32
    return %arg0, %c0_i32, %c0_i32_0 : i32, i32, i32
  }
}

</mosaic_0001>

<bundles_post_ra>
// kernel: tpu_custom_call.1
= control target key start
LH: loop header
LB: loop body
LE: loop exit
PB: predicated region body
PF: predicated region fallthrough
CT: control target
= control target key end

     0   :  { %s2211_s0 = inlined_call_operand.vmem [shape: bf16[2,256,48], index: 0, kind: input, shape index: {}]   ;;  %s2212_s1 = inlined_call_operand.vmem [shape: bf16[16,256], index: 1, kind: input, shape index: {}]   ;;  %s2213_s2 = inlined_call_operand.vmem [shape: f32[48,128], index: 2, kind: input, shape index: {}]   ;;  %s2214_s3 = inlined_call_operand.vmem [shape: f32[16,128], index: 3, kind: input, shape index: {}]   ;;  %s2215_s4 = inlined_call_operand.hbm [shape: f32[512,128], index: 4, kind: input, shape index: {}]   ;;  %s2216_s5 = inlined_call_operand.vmem [shape: f32[1,128], index: 5, kind: input, shape index: {}]   ;;  %s2217_s6 = inlined_call_operand.hbm [shape: f32[2,4,128], index: 6, kind: output, shape index: {0}]   ;;  %s2218_s7 = inlined_call_operand.hbm [shape: f32[2,4,512], index: 7, kind: output, shape index: {1}]   ;;  %s2219_s8 = inlined_call_operand.hbm [shape: f32[2,4,128], index: 8, kind: output, shape index: {2}]  }
   0x1   :  { %2223 = sst [smem:[#allocation13_spill]] %s2211_s0 }
   0x2   :  { %2224 = sst [smem:[#allocation14_spill]] %s2212_s1 }
   0x3   :  { %2225 = sst [smem:[#allocation15_spill]] %s2213_s2 }
   0x4   :  { %14 = vsyncpa [#allocation4], 0 }
   0x5   :  { %15 = vsyncpa [#allocation5], 0 }
   0x6   :  { %17 = vsyncpa [#allocation5 + $0x1], 0 }
   0x7   :  { %18 = vsyncpa [#allocation8], 0 }
   0x8   :  { %20 = vsyncpa [#allocation8 + $0x1], 0  ;;  %s1887_s27 = smov 0   ;;  %s1889_s28 = smov 0  }
   0x9   :  { %s1891_s29 = smov 0   ;;  %s1893_s30 = smov 0  }
   0xa   :  { %s1895_s9 = smov 0   ;;  %s1897_s10 = smov 0  }
   0xb LB: > { %s1918_s11 = sadd.s32 4294967295, %s1832_s10   ;;  %s2220_s12 = sadd.s32 4294967294, %s1832_s10   ;;  %s1832_s10 = sphi %s1897_s10, %s26_s10   ;;  %s1828_s9 = sphi %s1895_s9, %s2239_s9   ;;  %s1824_s30 = sphi %s1893_s30, %s2238_s30   ;;  %s1820_s29 = sphi %s1891_s29, %s2237_s29   ;;  %s1816_s28 = sphi %s1889_s28, %s2236_s28   ;;  %s1812_s27 = sphi %s1887_s27, %s2235_s27  }
   0xc   : > { %s38_s13 = sadd.s32 1, %s1828_s9  ;;  %s183_s14 = sadd.s32 1, %s1820_s29 }
   0xd   : > { %p40_p0 = scmp.ge.s32.totalorder %s38_s13, 2  ;;  %p193_p1 = scmp.ne.s32.totalorder %s1820_s29, %s1816_s28 }
   0xe   : > { %p194_p2 = scmp.eq.s32.totalorder %s1918_s11, 1  ;;  %p199_p3 = scmp.ne.s32.totalorder %s1816_s28, %s1812_s27 }
   0xf   : > { %s2241_s13 = smov (%p40_p0, %s38_s13), 0  ;;  %p200_p5 = scmp.eq.s32.totalorder %s2220_s12, 1 }
  0x10   : > { %p1930_p4 = por %p194_p2, %p193_p1  ;;  %s180_s16 = ssub.s32 %s1828_s9, %s2241_s13 }
  0x11   : > { %p1275_p6 = scmp.ge.s32.totalorder %s1832_s10, 1  ;;  %p181_p7 = scmp.eq.s32.totalorder %s180_s16, 0 }
  0x12   : > { %p1939_p8 = por %p200_p5, %p199_p3  ;;  %p259_p9 = scmp.lt.s32.totalorder %s1832_s10, 3 }
  0x13   : > { %s1945_s18 = scalar_select %p181_p7, %s1820_s29, %s183_s14  }
  0x14   : > { %p1947_p10 = pnand %p1275_p6, %p259_p9  ;;  %p1595_p11 = scmp.eq.s32.totalorder %s1918_s11, 0 }
  0x15   : > { %s1834_s20 = smov [#allocation3]  }
  0x16   : > { %p1581_p12 = pneg %p1947_p10  ;;  %s286_s21 = sshll.u32 %s1834_s20, 4  ;;  %s287_s21 = int_to_ptr.vmem [resolvable:$true] %s286_s21 }
  0x17   : > { %s1681_s22 = scalar_lea.vmem %s287_s21, 8192  ;;  %p1689_p5 = scmp.lt.s32.totalorder %s287_s21, %s287_s21 }
  0x18   : > { %p1582_p13 = pnand %p1595_p11, %p1581_p12  ;;  %p1682_p1 = scmp.ne.s32.totalorder %s287_s21, %s1681_s22 }
  0x19   : > { %p1690_p7 = scmp.lt.s32.totalorder %s1681_s22, %s1681_s22 }
  0x1a   : > { %p1672_p0 = pneg %p1582_p13 }
  0x1b   : > { %p1691_p6 = por %p1690_p7, %p1689_p5 }
  0x1c   : > { %p1684_p2 = pnand %p1682_p1, %p1672_p0 }
  0x1e   : > { %p1685_p3 = pneg %p1684_p2 }
  0x20   : > { %p1692_p9 = pnand %p1691_p6, %p1685_p3 }
  0x22   : > { %1695 = shalt.err (!%p1692_p9)
}
  0x23   : > { %s1835_s23 = smov 128   ;;  %s1836_s24 = smov 8  }
  0x24   : > { %1584 = dma.hbm_to_vmem [thread:$0]  (!%p1582_p13), %s2215_s4, 8192, %s287_s21, [#allocation4], %s1835_s23, %s1835_s23, %s1836_s24  }
  0x25   : > { %318 = sbr.rel (%p1947_p10) target bundleno = 741 (0x2e5), region = 44 }
  0x2a   : > { %1799 = dma.done.wait (%p1595_p11), [#allocation4], 8192  }
  0x2b   : > { %1801 = vsyncadd (%p1595_p11), [#allocation4], 4294959104  ;;  %p372_p12 = scmp.lt.s32.totalorder %s1824_s30, 1  ;;  %s2229_s0 = sld [smem:[#allocation13_spill]]  ;;  %vm392_vm0 = vcmask 392192   ;;  %v1837_v18 = vmov 0.0  }
  0x2c   : > { %s2230_s1 = sld [smem:[#allocation14_spill]]  ;;  %393 = vst.msk [vmem:[#allocation2] sm:$0xff] %vm392_vm0, %v1837_v18  ;;  %394 = vst.msk [vmem:[#allocation2 + $0x8] sm:$0xff] %vm392_vm0, %v1837_v18  ;;  %v699_v25 = vld [vmem:[#allocation3 + $0x78] sm:$0xff]  ;;  %v698_v26 = vld [vmem:[#allocation3 + $0x70] sm:$0xff]  ;;  %vm1838_vm1 = vmmov 0  }
  0x2d   : > { %s373_s14 = scalar_select %p372_p12, %s1824_s30, 1  ;;  %v697_v27 = vld [vmem:[#allocation3 + $0x68] sm:$0xff]  ;;  %v696_v28 = vld [vmem:[#allocation3 + $0x60] sm:$0xff]  ;;  %v695_v29 = vld [vmem:[#allocation3 + $0x58] sm:$0xff] }
  0x2e   : > { %s2231_s2 = sld [smem:[#allocation15_spill]]  ;;  %v694_v30 = vld [vmem:[#allocation3 + $0x50] sm:$0xff]  ;;  %v693_v31 = vld [vmem:[#allocation3 + $0x48] sm:$0xff]  ;;  %v692_v32 = vld [vmem:[#allocation3 + $0x40] sm:$0xff]  ;;  %s2059_s26 = sand.u32 1, %s1816_s28  }
  0x2f   : > { %s1316_s16 = sshll.u32 %s373_s14, 7  ;;  %v691_v33 = vld [vmem:[#allocation3 + $0x38] sm:$0xff]  ;;  %v690_v34 = vld [vmem:[#allocation3 + $0x30] sm:$0xff]  ;;  %v689_v35 = vld [vmem:[#allocation3 + $0x28] sm:$0xff]  ;;  %s2221_s22 = sshll.u32 %s2059_s26, 2 }
  0x30   : > { %v688_v36 = vld [vmem:[#allocation3 + $0x20] sm:$0xff]  ;;  %v721_v48 = vld [vmem:[#allocation3 + $0xf8] sm:$0xff]  ;;  %v720_v50 = vld [vmem:[#allocation3 + $0xf0] sm:$0xff]  ;;  %s1282_s19 = sshll.u32 %s2059_s26, 4  ;;  %s2073_s21 = scalar_lea.vmem [#allocation6], %s2221_s22 }
  0x31   : > { %s1970_s12 = scalar_lea.vmem %s2229_s0, %s1316_s16  ;;  %v719_v51 = vld [vmem:[#allocation3 + $0xe8] sm:$0xff]  ;;  %v718_v52 = vld [vmem:[#allocation3 + $0xe0] sm:$0xff]  ;;  %v717_v53 = vld [vmem:[#allocation3 + $0xd8] sm:$0xff]  ;;  %s2080_s23 = scalar_lea.vmem [#allocation7], %s1282_s19 }
  0x32   : > { %v1651_v0 = vld [vmem:[%s1970_s12 + $0x78] sm:$0xff]   ;;  %v1653_v2 = vld [vmem:[%s1970_s12 + $0x70] sm:$0xff]   ;;  %v1655_v4 = vld [vmem:[%s1970_s12 + $0x68] sm:$0xff]   ;;  %s1066_s24 = sand.u32 1, %s1918_s11   ;;  %s1317_s25 = sshll.u32 %s1824_s30, 8 }
  0x33   : > { %v1652_v1 = vld [vmem:[%s1970_s12 + $0x38] sm:$0xff]   ;;  %1318 = vmatprep.subr.bf16.mxu0 %v1651_v0  ;;  %v1654_v3 = vld [vmem:[%s1970_s12 + $0x30] sm:$0xff]   ;;  %v1656_v5 = vld [vmem:[%s1970_s12 + $0x28] sm:$0xff]   ;;  %s1097_s16 = scalar_lea.hbm %s2218_s7, %s1317_s25  ;;  %s1099_s20 = sshll.u32 %s2080_s23, 4  ;;  %s1100_s20 = int_to_ptr.vmem [resolvable:$true] %s1099_s20 }
  0x34   : > { %1319 = vmatpush3.bf16.msra.mxu0 %v1652_v1  ;;  %v1657_v6 = vld [vmem:[%s1970_s12 + $0x60] sm:$0xff]   ;;  %v1659_v8 = vld [vmem:[%s1970_s12 + $0x58] sm:$0xff]   ;;  %v1661_v10 = vld [vmem:[%s1970_s12 + $0x50] sm:$0xff]   ;;  %s2129_s19 = scalar_lea.sflag [#allocation8], %s1066_s24  ;;  %s1696_s22 = scalar_lea.vmem %s1100_s20, 256 }
  0x35   : > { %1320 = vmatprep.subr.bf16.mxu0 %v1653_v2  ;;  %v1658_v7 = vld [vmem:[%s1970_s12 + $0x20] sm:$0xff]   ;;  %v1660_v9 = vld [vmem:[%s1970_s12 + $0x18] sm:$0xff]   ;;  %v1662_v12 = vld [vmem:[%s1970_s12 + $0x10] sm:$0xff]   ;;  %p1697_p10 = scmp.ne.s32.totalorder %s1100_s20, %s1696_s22  ;;  %s1839_s0 = smov [#allocation7]  }
  0x36   : > { %v1669_v11 = vld [vmem:[%s2230_s1 + $0x4] ss:$8 sps:$4 sm:$0xff]   ;;  %v1667_v17 = vld [vmem:[%s2230_s1] ss:$8 sps:$4 sm:$0xff]   ;;  %v591_v21 = vld [vmem:[%s2231_s2 + $0x18] sm:$0xff]  ;;  %s1700_s1 = sshll.u32 %s1839_s0, 4  ;;  %s1701_s1 = int_to_ptr.vmem [resolvable:$false] %s1700_s1 }
  0x37   : > { %569 = vmatprep.mubr.bf16.mxu0 %v1669_v11  ;;  %v1663_v13 = vld [vmem:[%s1970_s12 + $0x48] sm:$0xff]   ;;  %v1665_v15 = vld [vmem:[%s1970_s12 + $0x40] sm:$0xff]   ;;  %v590_v22 = vld [vmem:[%s2231_s2 + $0x10] sm:$0xff]  ;;  %p1698_p11 = pnand %p1697_p10, %p1930_p4  ;;  %p1703_p0 = scmp.lt.s32.totalorder %s1100_s20, %s1701_s1 }
  0x38   : > { %1321 = vmatpush3.bf16.msra.mxu0 %v1654_v3  ;;  %v1664_v14 = vld [vmem:[%s1970_s12 + $0x8] sm:$0xff]   ;;  %v1666_v16 = vld [vmem:[%s1970_s12] sm:$0xff]   ;;  %v715_v55 = vld [vmem:[#allocation3 + $0xc8] sm:$0xff] }
  0x39   : > { %1322 = vmatprep.subr.bf16.mxu0 %v1655_v4  ;;  %v593_v19 = vld [vmem:[%s2231_s2 + $0x28] sm:$0xff]  ;;  %v592_v20 = vld [vmem:[%s2231_s2 + $0x20] sm:$0xff]  ;;  %v714_v56 = vld [vmem:[#allocation3 + $0xc0] sm:$0xff]  ;;  %p1699_p13 = pneg %p1698_p11 }
  0x3a   : > { %1416 = vmatprep.subr.mxu1 %v593_v19  ;;  %v589_v23 = vld [vmem:[%s2231_s2 + $0x8] sm:$0xff]  ;;  %v588_v24 = vld [vmem:[%s2231_s2] sm:$0xff]  ;;  %v711_v59 = vld [vmem:[#allocation3 + $0xa8] sm:$0xff]  ;;  %s1702_s2 = scalar_lea.vmem %s1701_s1, 512 }
  0x3b   : > { %1417 = vmatpush3.msra.mxu1 %v593_v19  ;;  %v395_v38 = vld [vmem:[#allocation2] sm:$0xff]  ;;  %v396_v43 = vld [vmem:[#allocation2 + $0x8] sm:$0xff]  ;;  %v710_v60 = vld [vmem:[#allocation3 + $0xa0] sm:$0xff]  ;;  %p1704_p1 = scmp.lt.s32.totalorder %s1702_s2, %s1696_s22 }
  0x3c   : > { %1323 = vmatpush3.bf16.msra.mxu0 %v1656_v5  ;;  %1418 = vmatprep.subr.mxu1 %v592_v20  ;;  %v716_v54 = vld [vmem:[#allocation3 + $0xd0] sm:$0xff]  ;;  %v713_v57 = vld [vmem:[#allocation3 + $0xb8] sm:$0xff]  ;;  %v685_v1 = vld [vmem:[#allocation3 + $0x8] sm:$0xff] }
  0x3d   : > { %1324 = vmatprep.subr.bf16.mxu0 %v1657_v6  ;;  %1419 = vmatpush3.msra.mxu1 %v592_v20  ;;  %v712_v58 = vld [vmem:[#allocation3 + $0xb0] sm:$0xff]  ;;  %v687_v61 = vld [vmem:[#allocation3 + $0x18] sm:$0xff]  ;;  %v707_v2 = vld [vmem:[#allocation3 + $0x88] sm:$0xff]  ;;  %p1705_p2 = por %p1704_p1, %p1703_p0 }
  0x3e   : > { %1420 = vmatprep.subr.mxu1 %v591_v21  ;;  %v709_v62 = vld [vmem:[#allocation3 + $0x98] sm:$0xff]  ;;  %v686_v63 = vld [vmem:[#allocation3 + $0x10] sm:$0xff]  ;;  %v684_v3 = vld [vmem:[#allocation3] sm:$0xff] }
  0x3f   : > { %1421 = vmatpush3.msra.mxu1 %v591_v21  ;;  %v708_v0 = vld [vmem:[#allocation3 + $0x90] sm:$0xff]  ;;  %v706_v4 = vld [vmem:[#allocation3 + $0x80] sm:$0xff]  ;;  %v595_v5 = vld [vmem:[%s2214_s3 + $0x8] sm:$0xff]  ;;  %p1706_p3 = pnand %p1705_p2, %p1699_p13 }
  0x40   : > { %1325 = vmatpush3.bf16.msra.mxu0 %v1658_v7  ;;  %1422 = vmatprep.subr.mxu1 %v590_v22  ;;  %v594_v7 = vld [vmem:[%s2214_s3] sm:$0xff]  ;;  %v980_v21 = vld [vmem:[#allocation3 + $0x1f8] sm:$0xff] }
  0x41   : > { %1326 = vmatprep.subr.bf16.mxu0 %v1659_v8  ;;  %1423 = vmatpush3.msra.mxu1 %v590_v22 }
  0x42   : > { %1424 = vmatprep.subr.mxu1 %v589_v23 }
  0x43   : > { %1425 = vmatpush3.msra.mxu1 %v589_v23 }
  0x44   : > { %1327 = vmatpush3.bf16.msra.mxu0 %v1660_v9  ;;  %1426 = vmatprep.subr.mxu1 %v588_v24 }
  0x45   : > { %1328 = vmatprep.subr.bf16.mxu0 %v1661_v10  ;;  %1427 = vmatpush3.msra.mxu1 %v588_v24 }
  0x46   : > { %1431 = vmatprep.subr.mxu1 %v1837_v18 }
  0x48   : > { %1329 = vmatpush3.bf16.msra.mxu0 %v1662_v12 }
  0x49   : > { %1330 = vmatprep.subr.bf16.mxu0 %v1663_v13 }
  0x4c   : > { %1331 = vmatpush3.bf16.msra.mxu0 %v1664_v14 }
  0x4d   : > { %1332 = vmatprep.subr.bf16.mxu0 %v1665_v15 }
  0x50   : > { %1333 = vmatpush3.bf16.msra.mxu0 %v1666_v16 }
  0x51   : > { %1466 = vmatprep.subr.mxu0 %v1837_v18 }
  0x53   : > { %570 = vmatmul.mubr.bf16.vlgmr.msra.gmra.mxu0 %v1667_v17 }
  0x54   : > { %1467 = vmatpush3.msra.mxu0 %v699_v25  ;;  %1498 = vmatprep.mubr.msk.f32.mxu0 %vm1838_vm1, %v1837_v18 }
  0x55   : > { %1468 = vmatprep.subr.mxu0 %v1837_v18 }
  0x56   : > { %1469 = vmatpush3.msra.mxu0 %v698_v26  ;;  %v888_v26 = vld [vmem:[#allocation3 + $0x178] sm:$0xff] }
  0x57   : > { %1470 = vmatprep.subr.mxu0 %v1837_v18 }
  0x58   : > { %1471 = vmatpush3.msra.mxu0 %v697_v27  ;;  %v979_v27 = vld [vmem:[#allocation3 + $0x1f0] sm:$0xff] }
  0x59   : > { %1472 = vmatprep.subr.mxu0 %v1837_v18 }
  0x5a   : > { %1473 = vmatpush3.msra.mxu0 %v696_v28  ;;  %v887_v28 = vld [vmem:[#allocation3 + $0x170] sm:$0xff] }
  0x5b   : > { %1474 = vmatprep.subr.mxu0 %v1837_v18 }
  0x5c   : > { %1475 = vmatpush3.msra.mxu0 %v695_v29  ;;  %v978_v29 = vld [vmem:[#allocation3 + $0x1e8] sm:$0xff] }
  0x5d   : > { %1476 = vmatprep.subr.mxu0 %v1837_v18 }
  0x5e   : > { %1477 = vmatpush3.msra.mxu0 %v694_v30  ;;  %v886_v30 = vld [vmem:[#allocation3 + $0x168] sm:$0xff] }
  0x5f   : > { %1478 = vmatprep.subr.mxu0 %v1837_v18 }
  0x60   : > { %1479 = vmatpush3.msra.mxu0 %v693_v31  ;;  %v977_v31 = vld [vmem:[#allocation3 + $0x1e0] sm:$0xff] }
  0x61   : > { %1480 = vmatprep.subr.mxu0 %v1837_v18 }
  0x62   : > { %1481 = vmatpush3.msra.mxu0 %v692_v32  ;;  %v885_v32 = vld [vmem:[#allocation3 + $0x160] sm:$0xff] }
  0x63   : > { %1482 = vmatprep.subr.mxu0 %v1837_v18 }
  0x64   : > { %1483 = vmatpush3.msra.mxu0 %v691_v33  ;;  %v976_v33 = vld [vmem:[#allocation3 + $0x1d8] sm:$0xff] }
  0x65   : > { %1484 = vmatprep.subr.mxu0 %v1837_v18 }
  0x66   : > { %1485 = vmatpush3.msra.mxu0 %v690_v34  ;;  %v884_v34 = vld [vmem:[#allocation3 + $0x158] sm:$0xff] }
  0x67   : > { %1486 = vmatprep.subr.mxu0 %v1837_v18 }
  0x68   : > { %1487 = vmatpush3.msra.mxu0 %v689_v35  ;;  %v975_v35 = vld [vmem:[#allocation3 + $0x1d0] sm:$0xff] }
  0x69   : > { %1488 = vmatprep.subr.mxu0 %v1837_v18 }
  0x6a   : > { %1489 = vmatpush3.msra.mxu0 %v688_v36  ;;  %v883_v36 = vld [vmem:[#allocation3 + $0x150] sm:$0xff] }
  0x6b   : > { %1490 = vmatprep.subr.mxu0 %v1837_v18 }
  0x6c   : > { %1491 = vmatpush3.msra.mxu0 %v687_v61 }
  0x6d   : > { %1492 = vmatprep.subr.mxu0 %v1837_v18 }
  0x6e   : > { %1493 = vmatpush3.msra.mxu0 %v686_v63 }
  0x6f   : > { %1494 = vmatprep.subr.mxu0 %v1837_v18 }
  0x70   : > { %1495 = vmatpush3.msra.mxu0 %v685_v1 }
  0x71   : > { %1496 = vmatprep.subr.mxu0 %v1837_v18 }
  0x72   : > { %1497 = vmatpush3.msra.mxu0 %v684_v3 }
  0x73   : > { %1536 = vmatprep.subr.mxu0 %v1837_v18 }
 0x113   : > { %v1334_v37 = vpop.f32.mrf.mxu0 }
 0x115   : > { %v1335_v39 = vpop.f32.mrf.mxu0 }
 0x116   : > { %v1336_v40 = vadd.f32 %v1335_v39, %v1334_v37  ;;  %v974_v37 = vld [vmem:[#allocation3 + $0x1c8] sm:$0xff]  ;;  %v973_v39 = vld [vmem:[#allocation3 + $0x1c0] sm:$0xff] }
 0x117   : > { %v1337_v41 = vpop.f32.mrf.mxu0 }
 0x118   : > { %v578_v42 = vadd.f32 %v1336_v40, %v395_v38  ;;  %v882_v38 = vld [vmem:[#allocation3 + $0x148] sm:$0xff]  ;;  %v881_v40 = vld [vmem:[#allocation3 + $0x140] sm:$0xff] }
 0x119   : > { %v1338_v44 = vpop.f32.mrf.mxu0 }
 0x11a   : > { %581 = vst.msk [vmem:[#allocation2] sm:$0xff] %vm392_vm0, %v578_v42  ;;  %v1339_v45 = vadd.f32 %v1338_v44, %v1337_v41  ;;  %v972_v41 = vld [vmem:[#allocation3 + $0x1b8] sm:$0xff]  ;;  %v879_v44 = vld [vmem:[#allocation3 + $0x130] sm:$0xff] }
 0x11b   : > { %v880_v42 = vld [vmem:[#allocation3 + $0x138] sm:$0xff] }
 0x11c   : > { %v579_v46 = vadd.f32 %v1339_v45, %v396_v43  ;;  %v971_v43 = vld [vmem:[#allocation3 + $0x1b0] sm:$0xff]  ;;  %v970_v45 = vld [vmem:[#allocation3 + $0x1a8] sm:$0xff] }
 0x11e   : > { %582 = vst.msk [vmem:[#allocation2 + $0x8] sm:$0xff] %vm392_vm0, %v579_v46  ;;  %v878_v46 = vld [vmem:[#allocation3 + $0x128] sm:$0xff] }
 0x121   : > { %v586_v47 = vld [vmem:[#allocation2] sm:$0xff] }
 0x122   : > { %1428 = vmatprep.mubr.msk.f32.mxu1 %vm392_vm0, %v586_v47  ;;  %v969_v47 = vld [vmem:[#allocation3 + $0x1a0] sm:$0xff] }
 0x125   : > { %v587_v49 = vld [vmem:[#allocation2 + $0x8] sm:$0xff] }
 0x126   : > { %1429 = vmatmul.mubr.msk.f32.vlgmr.msra.gmra.mxu1 %vm392_vm0, %v587_v49  ;;  %v968_v49 = vld [vmem:[#allocation3 + $0x198] sm:$0xff] }
 0x127   : > { %1432 = vmatpush3.msra.mxu1 %v721_v48  ;;  %1463 = vmatprep.mubr.msk.f32.mxu1 %vm1838_vm1, %v1837_v18  ;;  %v877_v48 = vld [vmem:[#allocation3 + $0x120] sm:$0xff] }
 0x128   : > { %1433 = vmatprep.subr.mxu1 %v1837_v18 }
 0x129   : > { %1434 = vmatpush3.msra.mxu1 %v720_v50  ;;  %v876_v50 = vld [vmem:[#allocation3 + $0x118] sm:$0xff] }
 0x12a   : > { %1435 = vmatprep.subr.mxu1 %v1837_v18 }
 0x12b   : > { %1436 = vmatpush3.msra.mxu1 %v719_v51  ;;  %v967_v51 = vld [vmem:[#allocation3 + $0x190] sm:$0xff] }
 0x12c   : > { %1437 = vmatprep.subr.mxu1 %v1837_v18 }
 0x12d   : > { %1438 = vmatpush3.msra.mxu1 %v718_v52  ;;  %v875_v52 = vld [vmem:[#allocation3 + $0x110] sm:$0xff] }
 0x12e   : > { %1439 = vmatprep.subr.mxu1 %v1837_v18 }
 0x12f   : > { %1440 = vmatpush3.msra.mxu1 %v717_v53  ;;  %v966_v53 = vld [vmem:[#allocation3 + $0x188] sm:$0xff] }
 0x130   : > { %1441 = vmatprep.subr.mxu1 %v1837_v18 }
 0x131   : > { %1442 = vmatpush3.msra.mxu1 %v716_v54  ;;  %v874_v54 = vld [vmem:[#allocation3 + $0x108] sm:$0xff] }
 0x132   : > { %1443 = vmatprep.subr.mxu1 %v1837_v18 }
 0x133   : > { %1444 = vmatpush3.msra.mxu1 %v715_v55  ;;  %v965_v55 = vld [vmem:[#allocation3 + $0x180] sm:$0xff] }
 0x134   : > { %1445 = vmatprep.subr.mxu1 %v1837_v18 }
 0x135   : > { %1446 = vmatpush3.msra.mxu1 %v714_v56  ;;  %v873_v56 = vld [vmem:[#allocation3 + $0x100] sm:$0xff] }
 0x136   : > { %1447 = vmatprep.subr.mxu1 %v1837_v18 }
 0x137   : > { %1448 = vmatpush3.msra.mxu1 %v713_v57 }
 0x138   : > { %1449 = vmatprep.subr.mxu1 %v1837_v18 }
 0x139   : > { %1450 = vmatpush3.msra.mxu1 %v712_v58 }
 0x13a   : > { %1451 = vmatprep.subr.mxu1 %v1837_v18 }
 0x13b   : > { %1452 = vmatpush3.msra.mxu1 %v711_v59 }
 0x13c   : > { %1453 = vmatprep.subr.mxu1 %v1837_v18 }
 0x13d   : > { %1454 = vmatpush3.msra.mxu1 %v710_v60 }
 0x13e   : > { %1455 = vmatprep.subr.mxu1 %v1837_v18 }
 0x13f   : > { %1456 = vmatpush3.msra.mxu1 %v709_v62 }
 0x140   : > { %1457 = vmatprep.subr.mxu1 %v1837_v18 }
 0x141   : > { %1458 = vmatpush3.msra.mxu1 %v708_v0 }
 0x142   : > { %1459 = vmatprep.subr.mxu1 %v1837_v18 }
 0x143   : > { %1460 = vmatpush3.msra.mxu1 %v707_v2 }
 0x144   : > { %1461 = vmatprep.subr.mxu1 %v1837_v18 }
 0x145   : > { %1462 = vmatpush3.msra.mxu1 %v706_v4 }
 0x146   : > { %1501 = vmatprep.subr.mxu1 %v1837_v18 }
 0x1e6   : > { %v1430_v6 = vpop.f32.mrf.mxu1 }
 0x1e7   : > { %v674_v8 = vadd.f32 %v1430_v6, %v595_v5 }
 0x1e8   : > { %v668_v9 = vpop.f32.mrf.mxu1 }
 0x1e9   : > { %v865_v10 = vrot.slane %v674_v8, 4  ;;  %v669_v11 = vadd.f32 %v668_v9, %v594_v7 }
 0x1eb   : > { %v867_v12 = vsub.f32 %v674_v8, %v865_v10  ;;  %v677_v13 = vmul.f32 0.015625, %v669_v11  ;;  %v679_v14 = vmul.f32 0.25, %v669_v11  ;;  %v701_v15 = vrot.slane %v669_v11, 4 }
 0x1ec   : > { %v962_v16 = vsub.f32 %v669_v11, %v865_v10 }
 0x1ed   : > { %v2069_v17 = vmul.f32 0.027777778, %v867_v12  ;;  %v681_v19 = vcombine.high %v679_v14, %v679_v14  ;;  %v792_v20 = vrot.slane %v679_v14, 4  ;;  %v703_v22 = vsub.f32 %v674_v8, %v701_v15  ;;  %678 = vst [vmem:[%s2073_s21] sm:$0xf] %v677_v13 }
 0x1ee   : > { %v2076_v23 = vmul.f32 0.015625, %v962_v16 }
 0x1ef   : > { %v870_v24 = vcombine.high %v2069_v17, %v2069_v17  ;;  %683 = vst [vmem:[%s2080_s23] sm:$0xf] %v681_v19  ;;  %1499 = vmatmul.mubr.f32.vlgmr.msra.gmra.mxu0 %v792_v20  ;;  %v704_v25 = vmul.f32 0.0625, %v703_v22  ;;  %v889_v57 = vrot.slane %v2069_v17, 4 }
 0x1f0   : > { %1537 = vmatpush3.msra.mxu0 %v980_v21  ;;  %1568 = vmatprep.mubr.msk.f32.mxu0 %vm1838_vm1, %v1837_v18  ;;  %964 = vst [vmem:[%s2080_s23 + $0xc] sm:$0xf] %v2076_v23 }
 0x1f1   : > { %872 = vst [vmem:[%s2080_s23 + $0x8] sm:$0xf] %v870_v24  ;;  %1538 = vmatprep.subr.mxu0 %v1837_v18  ;;  %705 = vst [vmem:[%s2080_s23 + $0x4] sm:$0xf] %v704_v25  ;;  %1464 = vmatmul.mubr.f32.vlgmr.msra.gmra.mxu1 %v704_v25 }
 0x1f2   : > { %1502 = vmatpush3.msra.mxu1 %v888_v26  ;;  %1539 = vmatpush3.msra.mxu0 %v979_v27 }
 0x1f3   : > { %1503 = vmatprep.subr.mxu1 %v1837_v18  ;;  %1540 = vmatprep.subr.mxu0 %v1837_v18 }
 0x1f4   : > { %1504 = vmatpush3.msra.mxu1 %v887_v28  ;;  %1541 = vmatpush3.msra.mxu0 %v978_v29 }
 0x1f5   : > { %1505 = vmatprep.subr.mxu1 %v1837_v18  ;;  %1542 = vmatprep.subr.mxu0 %v1837_v18 }
 0x1f6   : > { %1506 = vmatpush3.msra.mxu1 %v886_v30  ;;  %1543 = vmatpush3.msra.mxu0 %v977_v31 }
 0x1f7   : > { %1507 = vmatprep.subr.mxu1 %v1837_v18  ;;  %1544 = vmatprep.subr.mxu0 %v1837_v18 }
 0x1f8   : > { %1508 = vmatpush3.msra.mxu1 %v885_v32  ;;  %1545 = vmatpush3.msra.mxu0 %v976_v33 }
 0x1f9   : > { %1509 = vmatprep.subr.mxu1 %v1837_v18  ;;  %1546 = vmatprep.subr.mxu0 %v1837_v18 }
 0x1fa   : > { %1510 = vmatpush3.msra.mxu1 %v884_v34  ;;  %1547 = vmatpush3.msra.mxu0 %v975_v35 }
 0x1fb   : > { %1511 = vmatprep.subr.mxu1 %v1837_v18  ;;  %1548 = vmatprep.subr.mxu0 %v1837_v18 }
 0x1fc   : > { %1512 = vmatpush3.msra.mxu1 %v883_v36  ;;  %1549 = vmatpush3.msra.mxu0 %v974_v37 }
 0x1fd   : > { %1513 = vmatprep.subr.mxu1 %v1837_v18  ;;  %1550 = vmatprep.subr.mxu0 %v1837_v18 }
 0x1fe   : > { %1514 = vmatpush3.msra.mxu1 %v882_v38  ;;  %1551 = vmatpush3.msra.mxu0 %v973_v39 }
 0x1ff   : > { %1515 = vmatprep.subr.mxu1 %v1837_v18  ;;  %1552 = vmatprep.subr.mxu0 %v1837_v18 }
 0x200   : > { %1516 = vmatpush3.msra.mxu1 %v881_v40  ;;  %1553 = vmatpush3.msra.mxu0 %v972_v41 }
 0x201   : > { %1517 = vmatprep.subr.mxu1 %v1837_v18  ;;  %1554 = vmatprep.subr.mxu0 %v1837_v18 }
 0x202   : > { %1518 = vmatpush3.msra.mxu1 %v880_v42  ;;  %1555 = vmatpush3.msra.mxu0 %v971_v43 }
 0x203   : > { %1519 = vmatprep.subr.mxu1 %v1837_v18  ;;  %1556 = vmatprep.subr.mxu0 %v1837_v18 }
 0x204   : > { %1520 = vmatpush3.msra.mxu1 %v879_v44  ;;  %1557 = vmatpush3.msra.mxu0 %v970_v45 }
 0x205   : > { %1521 = vmatprep.subr.mxu1 %v1837_v18  ;;  %1558 = vmatprep.subr.mxu0 %v1837_v18 }
 0x206   : > { %1522 = vmatpush3.msra.mxu1 %v878_v46  ;;  %1559 = vmatpush3.msra.mxu0 %v969_v47 }
 0x207   : > { %1523 = vmatprep.subr.mxu1 %v1837_v18  ;;  %1560 = vmatprep.subr.mxu0 %v1837_v18 }
 0x208   : > { %1524 = vmatpush3.msra.mxu1 %v877_v48  ;;  %1561 = vmatpush3.msra.mxu0 %v968_v49 }
 0x209   : > { %1525 = vmatprep.subr.mxu1 %v1837_v18  ;;  %1562 = vmatprep.subr.mxu0 %v1837_v18 }
 0x20a   : > { %1526 = vmatpush3.msra.mxu1 %v876_v50  ;;  %1563 = vmatpush3.msra.mxu0 %v967_v51 }
 0x20b   : > { %1527 = vmatprep.subr.mxu1 %v1837_v18  ;;  %1564 = vmatprep.subr.mxu0 %v1837_v18 }
 0x20c   : > { %1528 = vmatpush3.msra.mxu1 %v875_v52  ;;  %1565 = vmatpush3.msra.mxu0 %v966_v53 }
 0x20d   : > { %1529 = vmatprep.subr.mxu1 %v1837_v18  ;;  %1566 = vmatprep.subr.mxu0 %v1837_v18 }
 0x20e   : > { %1530 = vmatpush3.msra.mxu1 %v874_v54  ;;  %1567 = vmatpush3.msra.mxu0 %v965_v55 }
 0x20f   : > { %1531 = vmatprep.subr.mxu1 %v1837_v18  ;;  %1569 = vmatmul.mubr.f32.vlgmr.msra.gmra.mxu0 %v2076_v23 }
 0x210   : > { %1532 = vmatpush3.msra.mxu1 %v873_v56  ;;  %1533 = vmatprep.mubr.msk.f32.mxu1 %vm1838_vm1, %v1837_v18 }
 0x211   : > { %1534 = vmatmul.mubr.f32.vlgmr.msra.gmra.mxu1 %v889_v57 }
 0x212   : > { %1709 = shalt.err (!%p1706_p3)
}
 0x213   : > { %s1710_s11 = scalar_lea.hbm %s1097_s16, 256  ;;  %s1714_s25 = scalar_lea.hbm %s2218_s7, 512 }
 0x214   : > { %p1711_p5 = scmp.ne.s32.totalorder %s1097_s16, %s1710_s11  ;;  %p1715_p9 = scmp.lt.s32.totalorder %s1097_s16, %s2218_s7 }
 0x215   : > { %p1716_p12 = scmp.lt.s32.totalorder %s1714_s25, %s1710_s11 }
 0x216   : > { %p1712_p7 = pnand %p1711_p5, %p1930_p4 }
 0x217   : > { %p1717_p10 = por %p1716_p12, %p1715_p9 }
 0x218   : > { %p1713_p6 = pneg %p1712_p7 }
 0x21a   : > { %p1718_p11 = pnand %p1717_p10, %p1713_p6 }
 0x21c   : > { %1721 = shalt.err (!%p1718_p11)
}
 0x21d   : > { %1576 = dma.vmem_to_hbm [thread:$0]  (%p1930_p4), %s1100_s20, 256, %s1097_s16, %s2129_s19  }
 0x21e   : > { %s2222_s0 = sshll.u32 %s1824_s30, 6  ;;  %s1085_s1 = sshll.u32 %s2073_s21, 4  ;;  %s1086_s1 = int_to_ptr.vmem [resolvable:$true] %s1085_s1 }
 0x21f   : > { %s1083_s23 = scalar_lea.hbm %s2217_s6, %s2222_s0  ;;  %s1062_s11 = scalar_lea.sflag [#allocation5], %s2059_s26 }
 0x220   : > { %s1722_s24 = scalar_lea.vmem %s1086_s1, 64  ;;  %s1840_s25 = smov [#allocation6]  }
 0x221   : > { %p1723_p13 = scmp.ne.s32.totalorder %s1086_s1, %s1722_s24  ;;  %s1726_s12 = sshll.u32 %s1840_s25, 4  ;;  %s1727_s12 = int_to_ptr.vmem [resolvable:$false] %s1726_s12 }
 0x222   : > { %s1728_s14 = scalar_lea.vmem %s1727_s12, 128  ;;  %p1729_p2 = scmp.lt.s32.totalorder %s1086_s1, %s1727_s12 }
 0x223   : > { %p1724_p0 = pnand %p1723_p13, %p1930_p4  ;;  %p1730_p3 = scmp.lt.s32.totalorder %s1728_s14, %s1722_s24 }
 0x225   : > { %p1725_p1 = pneg %p1724_p0  ;;  %p1731_p5 = por %p1730_p3, %p1729_p2 }
 0x227   : > { %p1732_p7 = pnand %p1731_p5, %p1725_p1 }
 0x229   : > { %1735 = shalt.err (!%p1732_p7)
}
 0x22a   : > { %s1736_s21 = scalar_lea.hbm %s1083_s23, 64  ;;  %s1740_s2 = scalar_lea.hbm %s2217_s6, 128 }
 0x22b   : > { %p1737_p6 = scmp.ne.s32.totalorder %s1083_s23, %s1736_s21  ;;  %p1741_p10 = scmp.lt.s32.totalorder %s1083_s23, %s2217_s6 }
 0x22c   : > { %p1742_p11 = scmp.lt.s32.totalorder %s1740_s2, %s1736_s21 }
 0x22d   : > { %p1738_p9 = pnand %p1737_p6, %p1930_p4 }
 0x22e   : > { %p1743_p13 = por %p1742_p11, %p1741_p10 }
 0x22f   : > { %p1739_p12 = pneg %p1738_p9 }
 0x231   : > { %p1744_p0 = pnand %p1743_p13, %p1739_p12 }
 0x233   : > { %1747 = shalt.err (!%p1744_p0)
}
 0x234   : > { %1575 = dma.vmem_to_hbm [thread:$0]  (%p1930_p4), %s1086_s1, 64, %s1083_s23, %s1062_s11   ;;  %v1306_v2 = vld [vmem:[%s2216_s5] ss:$0 sm:$0xff] }
 0x235   : > { %s2232_s25 = sshll.u32 %s2059_s26, 2  ;;  %s2233_s1 = sshll.u32 %s1824_s30, 6 }
 0x236   : > { %s370_s12 = scalar_lea.vmem [#allocation9], %s2232_s25  ;;  %s1110_s21 = scalar_lea.hbm %s2219_s8, %s2233_s1 }
 0x237   : > { %s1112_s14 = sshll.u32 %s370_s12, 4  ;;  %s1841_s20 = smov [#allocation9]   ;;  %s1113_s14 = int_to_ptr.vmem [resolvable:$true] %s1112_s14 }
 0x238   : > { %s1748_s16 = scalar_lea.vmem %s1113_s14, 64  ;;  %s1752_s2 = sshll.u32 %s1841_s20, 4  ;;  %s1753_s2 = int_to_ptr.vmem [resolvable:$false] %s1752_s2 }
 0x239   : > { %p1749_p1 = scmp.ne.s32.totalorder %s1113_s14, %s1748_s16  ;;  %s1754_s26 = scalar_lea.vmem %s1753_s2, 128 }
 0x23a   : > { %p1755_p5 = scmp.lt.s32.totalorder %s1113_s14, %s1753_s2  ;;  %p1756_p7 = scmp.lt.s32.totalorder %s1754_s26, %s1748_s16 }
 0x23b   : > { %p1750_p2 = pnand %p1749_p1, %p1930_p4 }
 0x23c   : > { %p1757_p6 = por %p1756_p7, %p1755_p5 }
 0x23d   : > { %p1751_p3 = pneg %p1750_p2 }
 0x23f   : > { %p1758_p9 = pnand %p1757_p6, %p1751_p3 }
 0x2af   : > { %v860_v18 = vpop.f32.mrf.mxu0 }
 0x2b1   : > { %v788_v58 = vpop.f32.mrf.mxu1  ;;  %v1500_v59 = vpop.f32.mrf.mxu0 }
 0x2b2   : > { %v861_v62 = vadd.f32 %v860_v18, %v788_v58 }
 0x2b3   : > { %v1465_v60 = vpop.f32.mrf.mxu1 }
 0x2cf   : > { %v1047_v61 = vpop.f32.mrf.mxu0 }
 0x2d1   : > { %v957_v63 = vpop.f32.mrf.mxu1  ;;  %v1570_v0 = vpop.f32.mrf.mxu0 }
 0x2d2   : > { %v961_v1 = vadd.f32 %v957_v63, %v861_v62 }
 0x2d3   : > { %v1535_v3 = vpop.f32.mrf.mxu1 }
 0x2d4   : > { %v1051_v4 = vadd.f32 %v1047_v61, %v961_v1 }
 0x2d6   : > { %v1059_v5 = vadd.f32 %v1306_v2, %v1051_v4 }
 0x2d8   : > { %1060 = vst [vmem:[%s370_s12] sm:$0xf] %v1059_v5 }
 0x2d9   : > { %1761 = shalt.err (!%p1758_p9)
}
 0x2da   : > { %s1762_s30 = scalar_lea.hbm %s1110_s21, 64  ;;  %s1766_s24 = scalar_lea.hbm %s2219_s8, 128 }
 0x2db   : > { %p1763_p12 = scmp.ne.s32.totalorder %s1110_s21, %s1762_s30  ;;  %p1767_p13 = scmp.lt.s32.totalorder %s1110_s21, %s2219_s8 }
 0x2dc   : > { %p1768_p0 = scmp.lt.s32.totalorder %s1766_s24, %s1762_s30 }
 0x2dd   : > { %p1764_p10 = pnand %p1763_p12, %p1930_p4 }
 0x2de   : > { %p1769_p1 = por %p1768_p0, %p1767_p13 }
 0x2df   : > { %p1765_p11 = pneg %p1764_p10 }
 0x2e1   : > { %p1770_p2 = pnand %p1769_p1, %p1765_p11 }
 0x2e3   : > { %1773 = shalt.err (!%p1770_p2)
}
 0x2e4   : > { %1577 = dma.vmem_to_hbm [thread:$0]  (%p1930_p4), %s1113_s14, 64, %s1110_s21, %s2129_s19  }
 0x2e5 PF: > { %p1597_p3 = scmp.ge.s32.totalorder %s1832_s10, 2  ;;  %s1124_s1 = sand.u32 1, %s1812_s27  }
 0x2e6   : > { %s1125_s23 = scalar_lea.sflag [#allocation5], %s1124_s1 }
 0x2e7   : > { %p1586_p5 = pnand %p1597_p3, %p1939_p8 }
 0x2e9   : > { %p1587_p7 = pneg %p1586_p5 }
 0x2eb   : > { %1803 = dma.done.wait (%p1587_p7), %s1125_s23, 64  }
 0x2ec   : > { %1805 = vsyncadd (%p1587_p7), %s1125_s23, 4294967232  ;;  %s2234_s11 = sadd.s32 4294967294, %s1832_s10  }
 0x2ed   : > { %s1133_s16 = sand.u32 1, %s2234_s11  }
 0x2ee   : > { %s1134_s20 = scalar_lea.sflag [#allocation8], %s1133_s16 }
 0x2ef   : > { %1807 = dma.done.wait (%p1587_p7), %s1134_s20, 320  }
 0x2f0   : > { %1809 = vsyncadd (%p1587_p7), %s1134_s20, 4294966976  ;;  %s26_s10 = sadd.s32 1, %s1832_s10   ;;  %s2235_s27 = smov %s1816_s28 }
 0x2f1   : > { %p23_p4 = scmp.ge.s32.totalorder %s26_s10, 4   ;;  %s2236_s28 = smov %s1820_s29 }
 0x2f2   : > { %s2237_s29 = smov %s1945_s18  ;;  %s2238_s30 = smov %s1828_s9 }
 0x2f3   : > { %s2239_s9 = smov %s2241_s13  ;;  %25 = sbr.rel (!%p23_p4) target bundleno = 11 (0xb), region = 127 }
 0x2f8   :  { %1148 = vsyncpa [#allocation4], 1 }
 0x2f9   :  { %1150 = vsyncpa [#allocation4 + $0x1], 1 }
 0x2fa   :  { %1151 = vsyncpa [#allocation5], 1 }
 0x2fb   :  { %1153 = vsyncpa [#allocation5 + $0x1], 1 }
 0x2fc   :  { %1154 = vsyncpa [#allocation8], 1 }
 0x2fd   :  { %1156 = vsyncpa [#allocation8 + $0x1], 1 }

</bundles_post_ra>
